<compile_context>
chip_gen: v6e
topology: v6e:2x2x1
jax: 0.10.0
libtpu: 0.0.40
codegen_flags: <defaults>
</compile_context>

<pallas_src>
import functools

import jax
import jax.numpy as jnp
from jax.experimental import pallas as pl
from jax.experimental.pallas import tpu as pltpu


def _yolo_kernel(x_ref, off_ref, anc_ref, o_ref, *, stride):
    """One (n_A, C5, N_TILE) block of the YOLO head transform.

    x_ref   : (n_A, C5, N_TILE)  raw detections (any float dtype)
    off_ref : (1,   2,  N_TILE)  [col; row] grid-cell offsets, f32
    anc_ref : (n_A, 2,  1)       per-anchor (w, h), f32
    o_ref   : (n_A, C5, N_TILE)  transformed detections, f32
    """
    # box centers (rows 0:2): sigmoid + grid-cell offset, scaled by stride
    xy = x_ref[:, 0:2, :].astype(jnp.float32)
    o_ref[:, 0:2, :] = (jax.nn.sigmoid(xy) + off_ref[...]) * stride

    # box sizes (rows 2:4): exp * per-anchor (w, h) — one broadcasted store
    wh = x_ref[:, 2:4, :].astype(jnp.float32)
    o_ref[:, 2:4, :] = jnp.exp(wh) * anc_ref[...]

    # objectness + class scores (rows 4:): sigmoid
    rest = x_ref[:, 4:, :].astype(jnp.float32)
    o_ref[:, 4:, :] = jax.nn.sigmoid(rest)


def _pick_n_tile(N, max_tile=2048):
    """Largest multiple-of-128 divisor of N that is <= max_tile.

    Falls back to a single full-width tile when N is small or not a multiple
    of 128 (the block then uses the full-dim escape of the (8, 128) rule).
    """
    if N <= max_tile or N % 128 != 0:
        return N
    for t in range((max_tile // 128) * 128, 0, -128):
        if N % t == 0:
            return t
    return N


def yolo_layer(x, anch, n_C, inp_dim):
    anchors = jnp.asarray(anch, dtype=jnp.float32)        # (n_A, 2)
    n_A = int(anchors.shape[0])
    C5 = n_C + 5
    B, C, G, G2 = x.shape
    assert C == n_A * C5 and G == G2
    N = G * G
    stride = float(inp_dim // G)     # matches torch's integer // division

    # same memory order as the torch .view(B, n_A, C5, G, G)
    x5 = x.reshape(B, n_A, C5, N)

    # grid-cell offsets: flat spatial index n = i*G + j -> col = j, row = i
    col = jnp.tile(jnp.arange(G, dtype=jnp.float32), (G,))
    row = jnp.repeat(jnp.arange(G, dtype=jnp.float32), G)
    off = jnp.stack([col, row], axis=0).reshape(1, 2, N)

    anc = anchors.reshape(n_A, 2, 1)

    n_tile = _pick_n_tile(N)
    n_tiles = N // n_tile

    kernel = functools.partial(_yolo_kernel, stride=stride)

    # donate the input HBM buffer to the output when dtypes line up (f32 path)
    io_aliases = {0: 0} if x5.dtype == jnp.float32 else {}

    out = pl.pallas_call(
        kernel,
        out_shape=jax.ShapeDtypeStruct((B, n_A, C5, N), jnp.float32),
        grid_spec=pltpu.PrefetchScalarGridSpec(
            num_scalar_prefetch=0,
            grid=(B, n_tiles),
            in_specs=[
                pl.BlockSpec((None, n_A, C5, n_tile), lambda b, t: (b, 0, 0, t)),
                pl.BlockSpec((1, 2, n_tile), lambda b, t: (0, 0, t)),
                pl.BlockSpec((n_A, 2, 1), lambda b, t: (0, 0, 0)),
            ],
            out_specs=pl.BlockSpec((None, n_A, C5, n_tile),
                                   lambda b, t: (b, 0, 0, t)),
        ),
        compiler_params=pltpu.CompilerParams(
            dimension_semantics=("parallel", "parallel")),
        input_output_aliases=io_aliases,
    )(x5, off, anc)

    # (B, n_A, C5, N) -> (B, n_A*N, C5); matches torch's
    # transpose(1,2).contiguous().view(B, C5, -1).transpose(1,2)
    # (flat detection index = a*G*G + i*G + j).  Kept in XLA: with C5 = 9 a
    # fused C5-minor kernel output would need 9-wide masked lane stores; for
    # real YOLO (C5 = 85) a fused-layout variant is worth benchmarking.
    return out.transpose(0, 1, 3, 2).reshape(B, n_A * N, C5)


def _yolo_reference(x, anch, n_C, inp_dim):
    # pure-JAX reference of the torch forward
    anch = jnp.asarray(anch, dtype=jnp.float32)
    n_A = anch.shape[0]
    C5 = n_C + 5
    B, C, G, _ = x.shape
    N = G * G
    stride = float(inp_dim // G)
    d = x.reshape(B, n_A, C5, G, G).astype(jnp.float32)
    xy = jax.nn.sigmoid(d[:, :, :2])
    wh = d[:, :, 2:4]
    rest = jax.nn.sigmoid(d[:, :, 4:])
    jj = jnp.broadcast_to(jnp.arange(G, dtype=jnp.float32)[None, :], (G, G))
    ii = jnp.broadcast_to(jnp.arange(G, dtype=jnp.float32)[:, None], (G, G))
    xy = xy.at[:, :, 0].add(jj).at[:, :, 1].add(ii) * stride
    wh = jnp.exp(wh) * anch[None, :, :, None, None]
    d = jnp.concatenate([xy, wh, rest], axis=2)
    return d.transpose(0, 1, 3, 4, 2).reshape(B, n_A * N, C5)


if __name__ == "__main__":
    key = jax.random.PRNGKey(0)
    B, n_C, G, inp_dim = 2, 4, 16, 64
    anch = [(10.0, 13.0), (16.0, 30.0), (33.0, 23.0)]
    n_A = len(anch)

    x = jax.random.normal(key, (B, n_A * (n_C + 5), G, G), dtype=jnp.float32)

    out = yolo_layer(x, anch, n_C, inp_dim)
    out = jax.block_until_ready(out)

    ref = _yolo_reference(x, anch, n_C, inp_dim)
    assert out.shape == (B, n_A * G * G, n_C + 5), out.shape
    assert jnp.allclose(out, ref, atol=1e-5, rtol=1e-5), "mismatch vs reference"

    print("KERNEL_OK")
</pallas_src>

<mosaic_0001>
module attributes {stable_mosaic.version = 11 : i64} {
  func.func @_yolo_kernel(%arg0: i32, %arg1: i32, %arg2: memref<1x3x9x256xf32, #tpu.memory_space<vmem>>, %arg3: memref<1x2x256xf32, #tpu.memory_space<vmem>>, %arg4: memref<3x2x1xf32, #tpu.memory_space<vmem>>, %arg5: memref<1x3x9x256xf32, #tpu.memory_space<vmem>>) attributes {dimension_semantics = [#tpu.dimension_semantics<parallel>, #tpu.dimension_semantics<parallel>], iteration_bounds = array<i64: 2, 1>, scalar_prefetch = 0 : i64, scratch_operands = 0 : i64, tpu.core_type = #tpu.core_type<tc>, window_params = [{transform_indices = @transform_0, window_bounds = array<i64: 1, 3, 9, 256>}, {transform_indices = @transform_1, window_bounds = array<i64: 1, 2, 256>}, {pipeline_mode = #tpu.pipeline_mode<synchronous>, transform_indices = @transform_2, window_bounds = array<i64: 3, 2, 1>}, {transform_indices = @transform_3, window_bounds = array<i64: 1, 3, 9, 256>}]} {
    %c0 = arith.constant 0 : index
    %c0_0 = arith.constant 0 : index
    %c0_1 = arith.constant 0 : index
    %c0_2 = arith.constant 0 : index
    %0 = vector.load %arg2[%c0, %c0_0, %c0_1, %c0_2] : memref<1x3x9x256xf32, #tpu.memory_space<vmem>>, vector<1x3x2x256xf32>
    %1 = vector.shape_cast %0 : vector<1x3x2x256xf32> to vector<3x2x256xf32>
    %2 = arith.negf %1 : vector<3x2x256xf32>
    %3 = math.exp %2 : vector<3x2x256xf32>
    %cst = arith.constant 1.000000e+00 : f32
    %4 = vector.broadcast %cst : f32 to vector<3x2x256xf32>
    %5 = arith.addf %4, %3 : vector<3x2x256xf32>
    %6 = arith.divf %4, %5 : vector<3x2x256xf32>
    %c0_3 = arith.constant 0 : index
    %c0_4 = arith.constant 0 : index
    %c0_5 = arith.constant 0 : index
    %7 = vector.load %arg3[%c0_3, %c0_4, %c0_5] : memref<1x2x256xf32, #tpu.memory_space<vmem>>, vector<1x2x256xf32>
    %8 = vector.broadcast %7 : vector<1x2x256xf32> to vector<3x2x256xf32>
    %9 = arith.addf %6, %8 : vector<3x2x256xf32>
    %cst_6 = arith.constant 4.000000e+00 : f32
    %10 = vector.broadcast %cst_6 : f32 to vector<3x2x256xf32>
    %11 = arith.mulf %9, %10 : vector<3x2x256xf32>
    %c0_7 = arith.constant 0 : index
    %c0_8 = arith.constant 0 : index
    %c0_9 = arith.constant 0 : index
    %c0_10 = arith.constant 0 : index
    %12 = vector.load %arg5[%c0_7, %c0_8, %c0_9, %c0_10] : memref<1x3x9x256xf32, #tpu.memory_space<vmem>>, vector<1x3x2x256xf32>
    %13 = vector.shape_cast %12 : vector<1x3x2x256xf32> to vector<3x2x256xf32>
    %14 = vector.shape_cast %11 : vector<3x2x256xf32> to vector<1x3x2x256xf32>
    tpu.vector_store %arg5[%c0_7, %c0_8, %c0_9, %c0_10], %14 {strides = array<i32>} : memref<1x3x9x256xf32, #tpu.memory_space<vmem>>, vector<1x3x2x256xf32>,
    %c0_11 = arith.constant 0 : index
    %c0_12 = arith.constant 0 : index
    %c2 = arith.constant 2 : index
    %c0_13 = arith.constant 0 : index
    %15 = vector.load %arg2[%c0_11, %c0_12, %c2, %c0_13] : memref<1x3x9x256xf32, #tpu.memory_space<vmem>>, vector<1x3x2x256xf32>
    %16 = vector.shape_cast %15 : vector<1x3x2x256xf32> to vector<3x2x256xf32>
    %17 = math.exp %16 : vector<3x2x256xf32>
    %c0_14 = arith.constant 0 : index
    %c0_15 = arith.constant 0 : index
    %c0_16 = arith.constant 0 : index
    %18 = vector.load %arg4[%c0_14, %c0_15, %c0_16] : memref<3x2x1xf32, #tpu.memory_space<vmem>>, vector<3x2x1xf32>
    %19 = vector.broadcast %18 : vector<3x2x1xf32> to vector<3x2x256xf32>
    %20 = arith.mulf %17, %19 : vector<3x2x256xf32>
    %c0_17 = arith.constant 0 : index
    %c0_18 = arith.constant 0 : index
    %c2_19 = arith.constant 2 : index
    %c0_20 = arith.constant 0 : index
    %21 = vector.load %arg5[%c0_17, %c0_18, %c2_19, %c0_20] : memref<1x3x9x256xf32, #tpu.memory_space<vmem>>, vector<1x3x2x256xf32>
    %22 = vector.shape_cast %21 : vector<1x3x2x256xf32> to vector<3x2x256xf32>
    %23 = vector.shape_cast %20 : vector<3x2x256xf32> to vector<1x3x2x256xf32>
    tpu.vector_store %arg5[%c0_17, %c0_18, %c2_19, %c0_20], %23 {strides = array<i32>} : memref<1x3x9x256xf32, #tpu.memory_space<vmem>>, vector<1x3x2x256xf32>,
    %c0_21 = arith.constant 0 : index
    %c0_22 = arith.constant 0 : index
    %c4 = arith.constant 4 : index
    %c0_23 = arith.constant 0 : index
    %24 = vector.load %arg2[%c0_21, %c0_22, %c4, %c0_23] : memref<1x3x9x256xf32, #tpu.memory_space<vmem>>, vector<1x3x5x256xf32>
    %25 = vector.shape_cast %24 : vector<1x3x5x256xf32> to vector<3x5x256xf32>
    %26 = arith.negf %25 : vector<3x5x256xf32>
    %27 = math.exp %26 : vector<3x5x256xf32>
    %cst_24 = arith.constant 1.000000e+00 : f32
    %28 = vector.broadcast %cst_24 : f32 to vector<3x5x256xf32>
    %29 = arith.addf %28, %27 : vector<3x5x256xf32>
    %30 = arith.divf %28, %29 : vector<3x5x256xf32>
    %c0_25 = arith.constant 0 : index
    %c0_26 = arith.constant 0 : index
    %c4_27 = arith.constant 4 : index
    %c0_28 = arith.constant 0 : index
    %31 = vector.load %arg5[%c0_25, %c0_26, %c4_27, %c0_28] : memref<1x3x9x256xf32, #tpu.memory_space<vmem>>, vector<1x3x5x256xf32>
    %32 = vector.shape_cast %31 : vector<1x3x5x256xf32> to vector<3x5x256xf32>
    %33 = vector.shape_cast %30 : vector<3x5x256xf32> to vector<1x3x5x256xf32>
    tpu.vector_store %arg5[%c0_25, %c0_26, %c4_27, %c0_28], %33 {strides = array<i32>} : memref<1x3x9x256xf32, #tpu.memory_space<vmem>>, vector<1x3x5x256xf32>,
    return
  }
  func.func @transform_0(%arg0: i32, %arg1: i32) -> (i32, i32, i32, i32) {
    %c0_i32 = arith.constant 0 : i32
    %c0_i32_0 = arith.constant 0 : i32
    %c0_i32_1 = arith.constant 0 : i32
    return %arg0, %c0_i32, %c0_i32_0, %arg1 : i32, i32, i32, i32
  }
  func.func @transform_1(%arg0: i32, %arg1: i32) -> (i32, i32, i32) {
    %c0_i32 = arith.constant 0 : i32
    %c0_i32_0 = arith.constant 0 : i32
    %c0_i32_1 = arith.constant 0 : i32
    return %c0_i32, %c0_i32_0, %arg1 : i32, i32, i32
  }
  func.func @transform_2(%arg0: i32, %arg1: i32) -> (i32, i32, i32) {
    %c0_i32 = arith.constant 0 : i32
    %c0_i32_0 = arith.constant 0 : i32
    %c0_i32_1 = arith.constant 0 : i32
    %c0_i32_2 = arith.constant 0 : i32
    return %c0_i32, %c0_i32_0, %c0_i32_1 : i32, i32, i32
  }
  func.func @transform_3(%arg0: i32, %arg1: i32) -> (i32, i32, i32, i32) {
    %c0_i32 = arith.constant 0 : i32
    %c0_i32_0 = arith.constant 0 : i32
    %c0_i32_1 = arith.constant 0 : i32
    return %arg0, %c0_i32, %c0_i32_0, %arg1 : i32, i32, i32, i32
  }
}

</mosaic_0001>

<bundles_post_ra>
// kernel: tpu_custom_call.1
= control target key start
LH: loop header
LB: loop body
LE: loop exit
PB: predicated region body
PF: predicated region fallthrough
CT: control target
= control target key end

     0   :  { %s739_s12 = smov 0   ;;  %s741_s13 = smov 0   ;;  %s843_s0 = inlined_call_operand.vmem [shape: f32[2,3,9,256], index: 0, kind: input, shape index: {}, may-alias: {0,3}]   ;;  %s844_s1 = inlined_call_operand.vmem [shape: f32[1,2,256], index: 1, kind: input, shape index: {}]   ;;  %s845_s2 = inlined_call_operand.vmem [shape: f32[3,2,1], index: 2, kind: input, shape index: {}]   ;;  %s846_s3 = inlined_call_operand.vmem [shape: f32[2,3,9,256], index: 3, kind: output, shape index: {}, may-alias: {0,3}]  }
   0x1   :  { %s743_s14 = smov 0  }
   0x2 LB: > { %s25_s15 = sadd.s32 1, %s712_s13  ;;  %p558_p0 = scmp.ge.s32.totalorder %s716_s14, 1  ;;  %s716_s14 = sphi %s743_s14, %s13_s14   ;;  %s712_s13 = sphi %s741_s13, %s848_s13   ;;  %s708_s12 = sphi %s739_s12, %s847_s12  }
   0x3   : > { %p27_p1 = scmp.ge.s32.totalorder %s25_s15, 2  ;;  %p169_p2 = scmp.lt.s32.totalorder %s716_s14, 3 }
   0x5   : > { %s850_s15 = smov (%p27_p1, %s25_s15), 0  ;;  %p170_p3 = pnand %p558_p0, %p169_p2 }
   0x6   : > { %p207_p4 = scmp.lt.s32.totalorder (!%p170_p3), %s708_s12, 1 }
   0x7   : > { %173 = sbr.rel (%p170_p3) target bundleno = 199 (0xc7), region = 32 }
   0xc   : > { %v322_v0 = vld [vmem:[%s845_s2] sm:$0x3]  ;;  %v324_v1 = vld [vmem:[%s845_s2 + $0x4] sm:$0x3]  ;;  %v718_v2 = vmov 0   ;;  %s852_s12 = smov (!%p207_p4, %s708_s12), 1 }
   0xd   : > { %608 = vset.pattern.permute.xlu0 %v718_v2  ;;  %609 = vset.pattern.permute.xlu1 %v718_v2  ;;  %v323_v3 = vld [vmem:[%s845_s2 + $0x2] sm:$0x3]  ;;  %s582_s22 = smul.u32 96, %s852_s12 }
   0xe   : > { %327 = vperm.xlu0 %608, %v322_v0   ;;  %335 = vperm.xlu1 %609, %v324_v1   ;;  %v567_v28 = vld.sshfl [vmem:[%s844_s1] sm:$0x33 pattern:$0x76325410] }
   0xf   : > { %s774_s25 = scalar_lea.vmem %s843_s0, %s582_s22  ;;  %v283_v29 = vcombine.high %v567_v28, %v567_v28  ;;  %s790_s30 = scalar_lea.vmem %s846_s3, %s582_s22 }
  0x10   : > { %v232_v4 = vld [vmem:[%s774_s25] sm:$0x3]  ;;  %v233_v5 = vld [vmem:[%s774_s25 + $0x8] sm:$0x3] }
  0x11   : > { %v234_v6 = vld [vmem:[%s774_s25 + $0x20] sm:$0x3]  ;;  %v235_v7 = vld [vmem:[%s774_s25 + $0x28] sm:$0x3]  ;;  %v561_v10 = vmul.f32 -1.442695, %v232_v4 }
  0x12   : > { %331 = vperm.xlu0 %608, %v323_v3   ;;  %v236_v8 = vld [vmem:[%s774_s25 + $0x40] sm:$0x3]  ;;  %v237_v9 = vld [vmem:[%s774_s25 + $0x48] sm:$0x3]  ;;  %v562_v11 = vmul.f32 -1.442695, %v233_v5 }
  0x13   : > { %v563_v12 = vmul.f32 -1.442695, %v234_v6  ;;  %v564_v13 = vmul.f32 -1.442695, %v235_v7  ;;  %610 = vpow2.f32 %v561_v10  ;;  %v565_v14 = vmul.f32 -1.442695, %v236_v8 }
  0x14   : > { %612 = vpow2.f32 %v562_v11  ;;  %v566_v15 = vmul.f32 -1.442695, %v237_v9 }
  0x15   : > { %614 = vpow2.f32 %v563_v12 }
  0x16   : > { %616 = vpow2.f32 %v564_v13 }
  0x17   : > { %618 = vpow2.f32 %v565_v14 }
  0x18   : > { %620 = vpow2.f32 %v566_v15 }
  0x20   : > { %v611_v16 = vpop.eup %610 }
  0x21   : > { %v613_v17 = vpop.eup %612  ;;  %v256_v18 = vadd.f32 1.0, %v611_v16 }
  0x22   : > { %v615_v19 = vpop.eup %614  ;;  %v257_v20 = vadd.f32 1.0, %v613_v17 }
  0x23   : > { %v617_v21 = vpop.eup %616  ;;  %v258_v22 = vadd.f32 1.0, %v615_v19  ;;  %622 = vrcp.f32 %v256_v18 }
  0x24   : > { %v619_v23 = vpop.eup %618  ;;  %v259_v24 = vadd.f32 1.0, %v617_v21  ;;  %624 = vrcp.f32 %v257_v20 }
  0x25   : > { %v621_v25 = vpop.eup %620  ;;  %v260_v26 = vadd.f32 1.0, %v619_v23  ;;  %626 = vrcp.f32 %v258_v22 }
  0x26   : > { %v261_v27 = vadd.f32 1.0, %v621_v25  ;;  %628 = vrcp.f32 %v259_v24 }
  0x27   : > { %630 = vrcp.f32 %v260_v26 }
  0x28   : > { %632 = vrcp.f32 %v261_v27 }
  0x30   : > { %v623_v30 = vpop.eup %622 }
  0x31   : > { %v625_v31 = vpop.eup %624  ;;  %v286_v32 = vadd.f32 %v623_v30, %v567_v28 }
  0x32   : > { %v627_v33 = vpop.eup %626  ;;  %v287_v34 = vadd.f32 %v625_v31, %v283_v29 }
  0x33   : > { %v629_v35 = vpop.eup %628  ;;  %v288_v36 = vadd.f32 %v627_v33, %v567_v28  ;;  %v292_v37 = vmul.f32 4.0, %v286_v32 }
  0x34   : > { %v631_v38 = vpop.eup %630  ;;  %v289_v39 = vadd.f32 %v629_v35, %v283_v29  ;;  %v293_v40 = vmul.f32 4.0, %v287_v34 }
  0x35   : > { %v633_v41 = vpop.eup %632  ;;  %v290_v42 = vadd.f32 %v631_v38, %v567_v28  ;;  %v294_v43 = vmul.f32 4.0, %v288_v36  ;;  %298 = vst [vmem:[%s790_s30] sm:$0x3] %v292_v37 }
  0x36   : > { %v291_v44 = vadd.f32 %v633_v41, %v283_v29  ;;  %v295_v45 = vmul.f32 4.0, %v289_v39  ;;  %299 = vst [vmem:[%s790_s30 + $0x8] sm:$0x3] %v293_v40 }
  0x37   : > { %v296_v46 = vmul.f32 4.0, %v290_v42  ;;  %300 = vst [vmem:[%s790_s30 + $0x20] sm:$0x3] %v294_v43 }
  0x38   : > { %v297_v47 = vmul.f32 4.0, %v291_v44  ;;  %301 = vst [vmem:[%s790_s30 + $0x28] sm:$0x3] %v295_v45 }
  0x39   : > { %302 = vst [vmem:[%s790_s30 + $0x40] sm:$0x3] %v296_v46 }
  0x3a   : > { %303 = vst [vmem:[%s790_s30 + $0x48] sm:$0x3] %v297_v47 }
  0x41   : > { %v304_v48 = vld [vmem:[%s774_s25] sm:$0xc]  ;;  %v305_v49 = vld [vmem:[%s774_s25 + $0x8] sm:$0xc] }
  0x42   : > { %v308_v50 = vld [vmem:[%s774_s25 + $0x40] sm:$0xc]  ;;  %v309_v51 = vld [vmem:[%s774_s25 + $0x48] sm:$0xc]  ;;  %v310_v52 = vmul.f32 1.442695, %v304_v48 }
  0x43   : > { %v312_v53 = vmul.f32 1.442695, %v305_v49  ;;  %v318_v54 = vmul.f32 1.442695, %v308_v50  ;;  %v306_v55 = vld [vmem:[%s774_s25 + $0x20] sm:$0xc] }
  0x44   : > { %v320_v56 = vmul.f32 1.442695, %v309_v51  ;;  %v307_v57 = vld [vmem:[%s774_s25 + $0x28] sm:$0xc]  ;;  %634 = vpow2.f32 %v310_v52  ;;  %v314_v58 = vmul.f32 1.442695, %v306_v55 }
  0x45   : > { %636 = vpow2.f32 %v312_v53  ;;  %v316_v59 = vmul.f32 1.442695, %v307_v57 }
  0x46   : > { %638 = vpow2.f32 %v318_v54 }
  0x47   : > { %640 = vpow2.f32 %v320_v56 }
  0x48   : > { %642 = vpow2.f32 %v314_v58 }
  0x49   : > { %644 = vpow2.f32 %v316_v59 }
  0x51   : > { %v635_v60 = vpop.eup %634 }
  0x52   : > { %v637_v61 = vpop.eup %636 }
  0x53   : > { %v639_v62 = vpop.eup %638 }
  0x54   : > { %v641_v63 = vpop.eup %640 }
  0x55   : > { %v643_v4 = vpop.eup %642 }
  0x56   : > { %v645_v9 = vpop.eup %644 }
  0x89   : > { %v328_v0 = vpop.permute.xlu0 %327  ;;  %v336_v1 = vpop.permute.xlu1 %335 }
  0x8a   : > { %v337_v2 = vrot.slane %v328_v0, 6  ;;  %v339_v3 = vrot.slane %v336_v1, 6 }
  0x8c   : > { %v343_v5 = vmul.f32 %v635_v60, %v337_v2  ;;  %v344_v6 = vmul.f32 %v637_v61, %v337_v2  ;;  %v347_v7 = vmul.f32 %v639_v62, %v339_v3  ;;  %v348_v8 = vmul.f32 %v641_v63, %v339_v3 }
  0x8d   : > { %v332_v10 = vpop.permute.xlu0 %331 }
  0x8e   : > { %349 = vst [vmem:[%s790_s30] sm:$0xc] %v343_v5  ;;  %350 = vst [vmem:[%s790_s30 + $0x8] sm:$0xc] %v344_v6  ;;  %v338_v11 = vrot.slane %v332_v10, 6 }
  0x8f   : > { %353 = vst [vmem:[%s790_s30 + $0x40] sm:$0xc] %v347_v7  ;;  %354 = vst [vmem:[%s790_s30 + $0x48] sm:$0xc] %v348_v8 }
  0x90   : > { %v345_v12 = vmul.f32 %v643_v4, %v338_v11  ;;  %v346_v13 = vmul.f32 %v645_v9, %v338_v11 }
  0x92   : > { %351 = vst [vmem:[%s790_s30 + $0x20] sm:$0xc] %v345_v12  ;;  %352 = vst [vmem:[%s790_s30 + $0x28] sm:$0xc] %v346_v13 }
  0x99   : > { %v355_v14 = vld [vmem:[%s774_s25] sm:$0xf0]  ;;  %v356_v15 = vld [vmem:[%s774_s25 + $0x8] sm:$0xf0]  ;;  %v357_v16 = vld [vmem:[%s774_s25 + $0x10] sm:$0x1] }
  0x9a   : > { %v358_v17 = vld [vmem:[%s774_s25 + $0x18] sm:$0x1]  ;;  %v359_v18 = vld [vmem:[%s774_s25 + $0x20] sm:$0xf0]  ;;  %v360_v19 = vld [vmem:[%s774_s25 + $0x28] sm:$0xf0] }
  0x9b   : > { %v568_v20 = vmul.f32 -1.442695, %v355_v14  ;;  %v569_v21 = vmul.f32 -1.442695, %v356_v15  ;;  %v570_v22 = vmul.f32 -1.442695, %v357_v16 }
  0x9c   : > { %v361_v23 = vld [vmem:[%s774_s25 + $0x30] sm:$0x1]  ;;  %v571_v24 = vmul.f32 -1.442695, %v358_v17  ;;  %v362_v25 = vld [vmem:[%s774_s25 + $0x38] sm:$0x1] }
  0x9d   : > { %646 = vpow2.f32 %v568_v20  ;;  %v572_v26 = vmul.f32 -1.442695, %v359_v18  ;;  %v363_v27 = vld [vmem:[%s774_s25 + $0x40] sm:$0xf0]  ;;  %v573_v28 = vmul.f32 -1.442695, %v360_v19 }
  0x9e   : > { %648 = vpow2.f32 %v569_v21  ;;  %v364_v29 = vld [vmem:[%s774_s25 + $0x48] sm:$0xf0]  ;;  %v574_v30 = vmul.f32 -1.442695, %v361_v23  ;;  %v365_v31 = vld [vmem:[%s774_s25 + $0x50] sm:$0x1] }
  0x9f   : > { %650 = vpow2.f32 %v570_v22  ;;  %v575_v32 = vmul.f32 -1.442695, %v362_v25  ;;  %v366_v33 = vld [vmem:[%s774_s25 + $0x58] sm:$0x1]  ;;  %v576_v34 = vmul.f32 -1.442695, %v363_v27 }
  0xa0   : > { %652 = vpow2.f32 %v571_v24  ;;  %v577_v35 = vmul.f32 -1.442695, %v364_v29  ;;  %v578_v36 = vmul.f32 -1.442695, %v365_v31  ;;  %v579_v37 = vmul.f32 -1.442695, %v366_v33 }
  0xa1   : > { %654 = vpow2.f32 %v572_v26 }
  0xa2   : > { %656 = vpow2.f32 %v573_v28 }
  0xa3   : > { %658 = vpow2.f32 %v574_v30 }
  0xa4   : > { %660 = vpow2.f32 %v575_v32 }
  0xa5   : > { %662 = vpow2.f32 %v576_v34 }
  0xa6   : > { %664 = vpow2.f32 %v577_v35 }
  0xa7   : > { %666 = vpow2.f32 %v578_v36 }
  0xa8   : > { %668 = vpow2.f32 %v579_v37 }
  0xaa   : > { %v647_v38 = vpop.eup %646 }
  0xab   : > { %v649_v39 = vpop.eup %648  ;;  %v403_v40 = vadd.f32 1.0, %v647_v38 }
  0xac   : > { %v651_v41 = vpop.eup %650  ;;  %v404_v42 = vadd.f32 1.0, %v649_v39 }
  0xad   : > { %v653_v43 = vpop.eup %652  ;;  %v405_v44 = vadd.f32 1.0, %v651_v41  ;;  %670 = vrcp.f32 %v403_v40 }
  0xae   : > { %v655_v45 = vpop.eup %654  ;;  %v406_v46 = vadd.f32 1.0, %v653_v43  ;;  %672 = vrcp.f32 %v404_v42 }
  0xaf   : > { %v657_v47 = vpop.eup %656  ;;  %v407_v48 = vadd.f32 1.0, %v655_v45  ;;  %674 = vrcp.f32 %v405_v44 }
  0xb0   : > { %v659_v49 = vpop.eup %658  ;;  %v408_v50 = vadd.f32 1.0, %v657_v47  ;;  %676 = vrcp.f32 %v406_v46 }
  0xb1   : > { %v661_v51 = vpop.eup %660  ;;  %v409_v52 = vadd.f32 1.0, %v659_v49  ;;  %678 = vrcp.f32 %v407_v48 }
  0xb2   : > { %v663_v53 = vpop.eup %662  ;;  %v410_v54 = vadd.f32 1.0, %v661_v51  ;;  %680 = vrcp.f32 %v408_v50 }
  0xb3   : > { %v665_v55 = vpop.eup %664  ;;  %v411_v56 = vadd.f32 1.0, %v663_v53  ;;  %682 = vrcp.f32 %v409_v52 }
  0xb4   : > { %v667_v57 = vpop.eup %666  ;;  %v412_v58 = vadd.f32 1.0, %v665_v55  ;;  %684 = vrcp.f32 %v410_v54 }
  0xb5   : > { %v669_v59 = vpop.eup %668  ;;  %v413_v60 = vadd.f32 1.0, %v667_v57  ;;  %686 = vrcp.f32 %v411_v56 }
  0xb6   : > { %v414_v61 = vadd.f32 1.0, %v669_v59  ;;  %688 = vrcp.f32 %v412_v58 }
  0xb7   : > { %690 = vrcp.f32 %v413_v60 }
  0xb8   : > { %692 = vrcp.f32 %v414_v61 }
  0xba   : > { %v671_v62 = vpop.eup %670 }
  0xbb   : > { %v673_v63 = vpop.eup %672  ;;  %439 = vst [vmem:[%s790_s30] sm:$0xf0] %v671_v62 }
  0xbc   : > { %v675_v0 = vpop.eup %674  ;;  %440 = vst [vmem:[%s790_s30 + $0x8] sm:$0xf0] %v673_v63 }
  0xbd   : > { %v677_v1 = vpop.eup %676  ;;  %441 = vst [vmem:[%s790_s30 + $0x10] sm:$0x1] %v675_v0 }
  0xbe   : > { %v679_v2 = vpop.eup %678  ;;  %442 = vst [vmem:[%s790_s30 + $0x18] sm:$0x1] %v677_v1 }
  0xbf   : > { %v681_v3 = vpop.eup %680  ;;  %443 = vst [vmem:[%s790_s30 + $0x20] sm:$0xf0] %v679_v2 }
  0xc0   : > { %v683_v4 = vpop.eup %682  ;;  %444 = vst [vmem:[%s790_s30 + $0x28] sm:$0xf0] %v681_v3 }
  0xc1   : > { %v685_v5 = vpop.eup %684  ;;  %445 = vst [vmem:[%s790_s30 + $0x30] sm:$0x1] %v683_v4 }
  0xc2   : > { %v687_v6 = vpop.eup %686  ;;  %446 = vst [vmem:[%s790_s30 + $0x38] sm:$0x1] %v685_v5 }
  0xc3   : > { %v689_v7 = vpop.eup %688  ;;  %447 = vst [vmem:[%s790_s30 + $0x40] sm:$0xf0] %v687_v6 }
  0xc4   : > { %v691_v8 = vpop.eup %690  ;;  %448 = vst [vmem:[%s790_s30 + $0x48] sm:$0xf0] %v689_v7 }
  0xc5   : > { %v693_v9 = vpop.eup %692  ;;  %449 = vst [vmem:[%s790_s30 + $0x50] sm:$0x1] %v691_v8 }
  0xc6   : > { %450 = vst [vmem:[%s790_s30 + $0x58] sm:$0x1] %v693_v9 }
  0xc7 PF: > { %s13_s14 = sadd.s32 1, %s716_s14   ;;  %s847_s12 = smov %s712_s13 }
  0xc8   : > { %p10_p5 = scmp.ge.s32.totalorder %s13_s14, 4   ;;  %s848_s13 = smov %s850_s15 }
  0xca   :  { %12 = sbr.rel (!%p10_p5) target bundleno = 2 (0x2), region = 65 }

</bundles_post_ra>
